<compile_context>
chip_gen: v5e
topology: v5e:2x2
jax: 0.10.0
libtpu: 0.0.40
codegen_flags: <defaults>
</compile_context>

<pallas_src>
import jax
import jax.numpy as jnp
from jax import lax
from jax.experimental import pallas as pl
from jax.experimental.pallas import tpu as pltpu

EPS = 1e-5
_LANE = 128                      # TPU lane width (last block dim granularity)
_TARGET_BLOCK_BYTES = 2 << 20    # ~2 MiB input blocks keep the DMA saturated
_VMEM_LIMIT_FLOOR = 32 << 20     # raise v5e's 16 MiB scoped default
_VMEM_LIMIT_CAP = 48 << 20       # stay well inside v7x's 64 MiB physical VMEM


def cln_kernel(x_ref, gamma_ref, beta_ref, o_ref):
    """x_ref: (BB, N, TK) tile; gamma/beta: (N, 1); normalize over axis 1."""
    x = x_ref[...].astype(jnp.float32)
    inv_n = jnp.float32(1.0 / x.shape[1])

    # Shifted two-pass statistics over the channel axis (axis 1 = sublanes).
    mean = jnp.sum(x, axis=1, keepdims=True) * inv_n          # (BB, 1, TK)
    xc = x - mean
    var = jnp.sum(xc * xc, axis=1, keepdims=True) * inv_n     # biased variance
    inv = lax.rsqrt(var + EPS)                                # (BB, 1, TK)

    g = gamma_ref[...].astype(jnp.float32)                    # (N, 1)
    b = beta_ref[...].astype(jnp.float32)                     # (N, 1)

    # Direct broadcasted affine: no full-size scale/shift temporaries.
    o_ref[...] = ((xc * inv) * g + b).astype(o_ref.dtype)


def _round_up(v, m):
    return ((v + m - 1) // m) * m


def _round_down(v, m):
    return (v // m) * m


def _choose_tiles(B, N, K, itemsize):
    """Pick (batch block, K block) sized by bytes, lane-dense in K."""
    k_full = _round_up(K, _LANE)
    tk = _round_down(max(_LANE, _TARGET_BLOCK_BYTES // (N * itemsize)), _LANE)
    tk = max(_LANE, min(tk, k_full))

    bb = 1
    blk_bytes = N * tk * itemsize
    if blk_bytes < _TARGET_BLOCK_BYTES:
        # Small-N shapes: block over batch too so per-step DMA stays large.
        bb = int(min(B, max(1, _TARGET_BLOCK_BYTES // blk_bytes)))

    # v7x megacore: prefer >=2 grid points when the data allows it.
    if pl.cdiv(B, bb) * pl.cdiv(K, tk) < 2:
        if B > 1:
            bb = (B + 1) // 2
        elif K > _LANE and tk > _LANE:
            tk = max(_LANE, _round_down(pl.cdiv(k_full, 2), _LANE))
    return bb, tk


@jax.jit
def channelwise_layer_norm(x, gamma, beta):
    """x: (B, N, K); gamma, beta: (N,). Returns (B, N, K) normalized over dim 1."""
    B, N, K = x.shape
    itemsize = jnp.dtype(x.dtype).itemsize
    bb, tk = _choose_tiles(B, N, K, itemsize)
    grid = (pl.cdiv(B, bb), pl.cdiv(K, tk))

    gamma2 = gamma.reshape(N, 1)
    beta2 = beta.reshape(N, 1)

    # Double-buffered in + out blocks, ~3 fp32 working copies, + headroom.
    blk_io_bytes = bb * N * tk * itemsize
    need = 4 * blk_io_bytes + 3 * bb * N * tk * 4 + (4 << 20)
    vmem_limit = int(min(_VMEM_LIMIT_CAP, max(_VMEM_LIMIT_FLOOR, need)))

    cost = pl.CostEstimate(
        flops=8 * B * N * K,
        transcendentals=B * K,
        bytes_accessed=2 * B * N * K * itemsize + 2 * N * 4,
    )

    return pl.pallas_call(
        cln_kernel,
        out_shape=jax.ShapeDtypeStruct((B, N, K), x.dtype),
        grid_spec=pltpu.PrefetchScalarGridSpec(
            num_scalar_prefetch=0,
            grid=grid,
            in_specs=[
                pl.BlockSpec((bb, N, tk), lambda bi, ki: (bi, 0, ki)),
                # Constant block index: gamma/beta DMA'd once, reused across grid.
                pl.BlockSpec((N, 1), lambda bi, ki: (0, 0)),
                pl.BlockSpec((N, 1), lambda bi, ki: (0, 0)),
            ],
            out_specs=pl.BlockSpec((bb, N, tk), lambda bi, ki: (bi, 0, ki)),
        ),
        compiler_params=pltpu.CompilerParams(
            dimension_semantics=("parallel", "parallel"),
            vmem_limit_bytes=vmem_limit,
        ),
        cost_estimate=cost,
    )(x, gamma2, beta2)


def reference_cln(x, gamma, beta):
    # permute(0,2,1) -> LayerNorm(last dim) -> permute back, in plain JAX.
    xt = jnp.transpose(x, (0, 2, 1)).astype(jnp.float32)   # (B, K, N)
    mean = jnp.mean(xt, axis=-1, keepdims=True)
    var = jnp.mean((xt - mean) ** 2, axis=-1, keepdims=True)
    yt = (xt - mean) / jnp.sqrt(var + EPS) * gamma + beta
    return jnp.transpose(yt, (0, 2, 1)).astype(x.dtype)


if __name__ == "__main__":
    key = jax.random.PRNGKey(0)
    B, N, K = 2, 4, 16
    x = jax.random.normal(key, (B, N, K), dtype=jnp.float32)
    # Deterministic parameter init matching nn.LayerNorm defaults / reset_parameters.
    gamma = jnp.ones((N,), dtype=jnp.float32)
    beta = jnp.zeros((N,), dtype=jnp.float32)

    out = jax.block_until_ready(channelwise_layer_norm(x, gamma, beta))

    ref = reference_cln(x, gamma, beta)
    assert out.shape == (B, N, K)
    assert jnp.allclose(out, ref, atol=1e-4, rtol=1e-4), "mismatch vs reference"
    print("KERNEL_OK")
</pallas_src>

<mosaic_0001>
module attributes {stable_mosaic.version = 11 : i64} {
  func.func @cln_kernel(%arg0: i32, %arg1: i32, %arg2: memref<1x4x128xf32, #tpu.memory_space<vmem>>, %arg3: memref<4x1xf32, #tpu.memory_space<vmem>>, %arg4: memref<4x1xf32, #tpu.memory_space<vmem>>, %arg5: memref<1x4x128xf32, #tpu.memory_space<vmem>>) attributes {dimension_semantics = [#tpu.dimension_semantics<parallel>, #tpu.dimension_semantics<parallel>], iteration_bounds = array<i64: 2, 1>, scalar_prefetch = 0 : i64, scratch_operands = 0 : i64, tpu.core_type = #tpu.core_type<tc>, window_params = [{transform_indices = @transform_0, window_bounds = array<i64: 1, 4, 128>}, {pipeline_mode = #tpu.pipeline_mode<synchronous>, transform_indices = @transform_1, window_bounds = array<i64: 4, 1>}, {pipeline_mode = #tpu.pipeline_mode<synchronous>, transform_indices = @transform_2, window_bounds = array<i64: 4, 1>}, {transform_indices = @transform_3, window_bounds = array<i64: 1, 4, 128>}]} {
    %c0 = arith.constant 0 : index
    %c0_0 = arith.constant 0 : index
    %c0_1 = arith.constant 0 : index
    %0 = vector.load %arg2[%c0, %c0_0, %c0_1] : memref<1x4x128xf32, #tpu.memory_space<vmem>>, vector<1x4x128xf32>
    %cst = arith.constant dense<0.000000e+00> : vector<1x128xf32>
    %1 = vector.multi_reduction <add>, %0, %cst [1] : vector<1x4x128xf32> to vector<1x128xf32>
    %2 = vector.shape_cast %1 : vector<1x128xf32> to vector<1x1x128xf32>
    %cst_2 = arith.constant 2.500000e-01 : f32
    %3 = vector.broadcast %cst_2 : f32 to vector<1x1x128xf32>
    %4 = arith.mulf %2, %3 : vector<1x1x128xf32>
    %5 = vector.broadcast %4 : vector<1x1x128xf32> to vector<1x4x128xf32>
    %6 = arith.subf %0, %5 : vector<1x4x128xf32>
    %7 = arith.mulf %6, %6 : vector<1x4x128xf32>
    %cst_3 = arith.constant dense<0.000000e+00> : vector<1x128xf32>
    %8 = vector.multi_reduction <add>, %7, %cst_3 [1] : vector<1x4x128xf32> to vector<1x128xf32>
    %9 = vector.shape_cast %8 : vector<1x128xf32> to vector<1x1x128xf32>
    %cst_4 = arith.constant 2.500000e-01 : f32
    %10 = vector.broadcast %cst_4 : f32 to vector<1x1x128xf32>
    %11 = arith.mulf %9, %10 : vector<1x1x128xf32>
    %cst_5 = arith.constant 9.99999974E-6 : f32
    %12 = vector.broadcast %cst_5 : f32 to vector<1x1x128xf32>
    %13 = arith.addf %11, %12 : vector<1x1x128xf32>
    %14 = math.rsqrt %13 : vector<1x1x128xf32>
    %c0_6 = arith.constant 0 : index
    %c0_7 = arith.constant 0 : index
    %15 = vector.load %arg3[%c0_6, %c0_7] : memref<4x1xf32, #tpu.memory_space<vmem>>, vector<4x1xf32>
    %c0_8 = arith.constant 0 : index
    %c0_9 = arith.constant 0 : index
    %16 = vector.load %arg4[%c0_8, %c0_9] : memref<4x1xf32, #tpu.memory_space<vmem>>, vector<4x1xf32>
    %17 = vector.broadcast %14 : vector<1x1x128xf32> to vector<1x4x128xf32>
    %18 = arith.mulf %6, %17 : vector<1x4x128xf32>
    %19 = vector.shape_cast %15 : vector<4x1xf32> to vector<1x4x1xf32>
    %20 = vector.broadcast %19 : vector<1x4x1xf32> to vector<1x4x128xf32>
    %21 = arith.mulf %18, %20 : vector<1x4x128xf32>
    %22 = vector.shape_cast %16 : vector<4x1xf32> to vector<1x4x1xf32>
    %23 = vector.broadcast %22 : vector<1x4x1xf32> to vector<1x4x128xf32>
    %24 = arith.addf %21, %23 : vector<1x4x128xf32>
    %c0_10 = arith.constant 0 : index
    %c0_11 = arith.constant 0 : index
    %c0_12 = arith.constant 0 : index
    %25 = vector.load %arg5[%c0_10, %c0_11, %c0_12] : memref<1x4x128xf32, #tpu.memory_space<vmem>>, vector<1x4x128xf32>
    tpu.vector_store %arg5[%c0_10, %c0_11, %c0_12], %24 {strides = array<i32>} : memref<1x4x128xf32, #tpu.memory_space<vmem>>, vector<1x4x128xf32>,
    return
  }
  func.func @transform_0(%arg0: i32, %arg1: i32) -> (i32, i32, i32) {
    %c0_i32 = arith.constant 0 : i32
    %c0_i32_0 = arith.constant 0 : i32
    return %arg0, %c0_i32, %arg1 : i32, i32, i32
  }
  func.func @transform_1(%arg0: i32, %arg1: i32) -> (i32, i32) {
    %c0_i32 = arith.constant 0 : i32
    %c0_i32_0 = arith.constant 0 : i32
    %c0_i32_1 = arith.constant 0 : i32
    return %c0_i32, %c0_i32_0 : i32, i32
  }
  func.func @transform_2(%arg0: i32, %arg1: i32) -> (i32, i32) {
    %c0_i32 = arith.constant 0 : i32
    %c0_i32_0 = arith.constant 0 : i32
    %c0_i32_1 = arith.constant 0 : i32
    return %c0_i32, %c0_i32_0 : i32, i32
  }
  func.func @transform_3(%arg0: i32, %arg1: i32) -> (i32, i32, i32) {
    %c0_i32 = arith.constant 0 : i32
    %c0_i32_0 = arith.constant 0 : i32
    return %arg0, %c0_i32, %arg1 : i32, i32, i32
  }
}

</mosaic_0001>

<bundles_post_ra>
// kernel: channelwise_layer_norm.1
= control target key start
LH: loop header
LB: loop body
LE: loop exit
PB: predicated region body
PF: predicated region fallthrough
CT: control target
= control target key end

     0   :  { %8 = vsyncpa [#allocation3], 0  ;;  %s600_s0 = inlined_call_operand.vmem [shape: f32[2,4,16], index: 0, kind: input, shape index: {}]   ;;  %s601_s1 = inlined_call_operand.vmem [shape: f32[4,1], index: 1, kind: input, shape index: {}]   ;;  %s602_s2 = inlined_call_operand.vmem [shape: f32[4,1], index: 2, kind: input, shape index: {}]   ;;  %s603_s3 = inlined_call_operand.hbm [shape: f32[2,4,16], index: 3, kind: output, shape index: {}]  }
   0x1   :  { %10 = vsyncpa [#allocation3 + $0x1], 0  ;;  %s497_s12 = smov 0   ;;  %s499_s13 = smov 0  }
   0x2   :  { %s501_s14 = smov 0   ;;  %s503_s15 = smov 0  }
   0x3   :  { %s505_s16 = smov 0   ;;  %s507_s17 = smov 0  }
   0x4 LB: > { %s326_s18 = sadd.s32 4294967295, %s474_s17   ;;  %s327_s19 = sadd.s32 4294967294, %s474_s17   ;;  %s474_s17 = sphi %s507_s17, %s16_s17   ;;  %s470_s16 = sphi %s505_s16, %s610_s16   ;;  %s466_s15 = sphi %s503_s15, %s609_s15   ;;  %s462_s14 = sphi %s501_s14, %s608_s14   ;;  %s458_s13 = sphi %s499_s13, %s607_s13   ;;  %s454_s12 = sphi %s497_s12, %s606_s12  }
   0x5   : > { %s28_s20 = sadd.s32 1, %s470_s16  ;;  %s107_s21 = sadd.s32 1, %s462_s14 }
   0x6   : > { %p30_p0 = scmp.ge.s32.totalorder %s28_s20, 2  ;;  %p117_p1 = scmp.ne.s32.totalorder %s462_s14, %s458_s13 }
   0x7   : > { %p118_p2 = scmp.eq.s32.totalorder %s326_s18, 1  ;;  %p123_p3 = scmp.ne.s32.totalorder %s458_s13, %s454_s12 }
   0x8   : > { %s612_s20 = smov (%p30_p0, %s28_s20), 0  ;;  %p124_p5 = scmp.eq.s32.totalorder %s327_s19, 1 }
   0x9   : > { %p537_p4 = por %p118_p2, %p117_p1  ;;  %s102_s23 = ssub.s32 %s470_s16, %s612_s20 }
   0xa   : > { %p330_p6 = scmp.ge.s32.totalorder %s474_s17, 1  ;;  %p105_p7 = scmp.eq.s32.totalorder %s102_s23, 0 }
   0xb   : > { %p544_p8 = por %p124_p5, %p123_p3  ;;  %p158_p9 = scmp.lt.s32.totalorder %s474_s17, 3 }
   0xc   : > { %s550_s25 = scalar_select %p105_p7, %s462_s14, %s107_s21  }
   0xd   : > { %p159_p10 = pnand %p330_p6, %p158_p9 }
   0xe   : > { %p184_p11 = scmp.lt.s32.totalorder (!%p159_p10), %s466_s15, 1  ;;  %s181_s8 = sand.u32 (!%p159_p10), 1, %s458_s13  }
   0xf   : > { %162 = sbr.rel (%p159_p10) target bundleno = 150 (0x96), region = 32  ;;  %s331_s9 = sshll.u32 (!%p159_p10), %s181_s8, 2 }
  0x10   : > { %s334_s10 = sshll.u32 (!%p159_p10), %s466_s15, 2  ;;  %s183_s21 = scalar_lea.vmem (!%p159_p10), [#allocation2], %s331_s9 }
  0x11   : > { %s250_s19 = scalar_lea.hbm (!%p159_p10), %s603_s3, %s334_s10  ;;  %s252_s23 = sshll.u32 (!%p159_p10), %s183_s21, 4  ;;  %s253_s23 = int_to_ptr.vmem [resolvable:$true] %s252_s23 }
  0x12   : > { %s254_s26 = sshll.u32 (!%p159_p10), %s250_s19, 4  ;;  %s239_s27 = scalar_lea.sflag (!%p159_p10), [#allocation3], %s181_s8  ;;  %s255_s26 = int_to_ptr.hbm [resolvable:$true] %s254_s26 }
  0x13   : > { %s410_s28 = sshra.s32 (!%p159_p10), %s255_s26, 4  ;;  %s411_s28 = int_to_ptr.hbm [resolvable:$true] %s410_s28 }
  0x14   : > { %v222_v0 = vld [vmem:[%s601_s1] sm:$0xf]  ;;  %v476_v1 = vmov 0   ;;  %s185_s30 = scalar_select %p184_p11, %s466_s15, 1  ;;  %vm192_vm0 = vcmask 1043456  }
  0x15   : > { %393 = vset.pattern.permute.xlu0 %v476_v1  ;;  %v223_v2 = vld [vmem:[%s602_s2] sm:$0xf]  ;;  %s412_s29 = scalar_lea.hbm %s411_s28, 4  ;;  %p417_p1 = scmp.lt.s32.totalorder %s411_s28, %s603_s3 }
  0x16   : > { %227 = vperm.xlu0 %393, %v222_v0   ;;  %s332_s4 = sshll.u32 %s185_s30, 2  ;;  %p413_p12 = scmp.ne.s32.totalorder %s411_s28, %s412_s29 }
  0x17   : > { %s190_s7 = scalar_lea.vmem %s600_s0, %s332_s4  ;;  %s416_s4 = scalar_lea.hbm %s603_s3, 8 }
  0x18   : > { %v191_v3 = vld [vmem:[%s190_s7] sm:$0xf]  ;;  %p414_p13 = pnand %p413_p12, %p537_p4  ;;  %p418_p2 = scmp.lt.s32.totalorder %s416_s4, %s412_s29 }
  0x19   : > { %v193_v4 = vsel %vm192_vm0, %v191_v3, 0.0 }
  0x1a   : > { %v194_v5 = vrot.slane %v193_v4, 4  ;;  %p415_p0 = pneg %p414_p13  ;;  %p419_p3 = por %p418_p2, %p417_p1 }
  0x1c   : > { %v195_v6 = vadd.f32 %v194_v5, %v193_v4  ;;  %p420_p5 = pnand %p419_p3, %p415_p0 }
  0x1e   : > { %233 = vperm.xlu0 %393, %v223_v2   ;;  %v196_v7 = vrot.slane %v195_v6, 2 }
  0x20   : > { %v197_v8 = vadd.f32 %v196_v7, %v195_v6 }
  0x22   : > { %v198_v9 = vrot.slane %v197_v8, 1 }
  0x24   : > { %v199_v10 = vadd.f32 %v198_v9, %v197_v8 }
  0x26   : > { %v200_v11 = vmul.f32 0.25, %v199_v10 }
  0x28   : > { %v201_v12 = vsub.f32 %v191_v3, %v200_v11 }
  0x2a   : > { %v202_v13 = vmul.f32 %v201_v12, %v201_v12 }
  0x2c   : > { %v203_v14 = vsel %vm192_vm0, %v202_v13, 0.0 }
  0x2d   : > { %v204_v15 = vrot.slane %v203_v14, 4 }
  0x2f   : > { %v205_v16 = vadd.f32 %v204_v15, %v203_v14 }
  0x31   : > { %v206_v17 = vrot.slane %v205_v16, 2 }
  0x33   : > { %v207_v18 = vadd.f32 %v206_v17, %v205_v16 }
  0x35   : > { %v208_v19 = vrot.slane %v207_v18, 1 }
  0x37   : > { %v209_v20 = vadd.f32 %v208_v19, %v207_v18 }
  0x39   : > { %v210_v21 = vmul.f32 0.25, %v209_v20 }
  0x3b   : > { %v211_v22 = vadd.f32 1e-05, %v210_v21 }
  0x3d   : > { %394 = vrsqrt.f32 %v211_v22  ;;  %vm218_vm1 = vweird.f32 %v211_v22 }
  0x43   : > { %v395_v23 = vpop.eup %394 }
  0x44   : > { %v213_v24 = vmul.f32 %v395_v23, %v211_v22  ;;  %vm219_vm2 = vweird.f32 %v395_v23 }
  0x45   : > { %vm220_vm3 = vmor %vm218_vm1, %vm219_vm2 }
  0x46   : > { %v214_v25 = vmul.f32 %v395_v23, %v213_v24 }
  0x48   : > { %v215_v26 = vmul.f32 0.5, %v214_v25 }
  0x4a   : > { %v216_v27 = vsub.f32 1.5, %v215_v26 }
  0x4c   : > { %v217_v28 = vmul.f32 %v395_v23, %v216_v27 }
  0x4e   : > { %v221_v30 = vsel %vm220_vm3, %v395_v23, %v217_v28 }
  0x4f   : > { %v224_v31 = vmul.f32 %v221_v30, %v201_v12 }
  0x88   : > { %v228_v29 = vpop.permute.xlu0 %227 }
  0x89   : > { %v230_v32 = vmul.f32 %v228_v29, %v224_v31 }
  0x90   : > { %v234_v33 = vpop.permute.xlu0 %233 }
  0x91   : > { %v236_v34 = vadd.f32 %v234_v33, %v230_v32 }
  0x93   : > { %237 = vst [vmem:[%s183_s21] sm:$0xf] %v236_v34 }
  0x94   : > { %423 = shalt.err (!%p420_p5)
}
  0x95   : > { %337 = dma.vmem_to_hbm [thread:$0]  (%p537_p4), %s253_s23, 64, %s255_s26, %s239_s27  }
  0x96 PF: > { %p343_p6 = scmp.ge.s32.totalorder %s474_s17, 2  ;;  %s266_s7 = sand.u32 1, %s454_s12  }
  0x97   : > { %s267_s8 = scalar_lea.sflag [#allocation3], %s266_s7 }
  0x98   : > { %p340_p7 = pnand %p343_p6, %p544_p8 }
  0x9a   : > { %p341_p9 = pneg %p340_p7 }
  0x9c   : > { %449 = dma.done.wait (%p341_p9), %s267_s8, 64  }
  0x9d   : > { %451 = vsyncadd (%p341_p9), %s267_s8, 4294967232  ;;  %s16_s17 = sadd.s32 1, %s474_s17   ;;  %s606_s12 = smov %s458_s13 }
  0x9e   : > { %p13_p10 = scmp.ge.s32.totalorder %s16_s17, 4   ;;  %s607_s13 = smov %s462_s14 }
  0x9f   : > { %s608_s14 = smov %s550_s25  ;;  %s609_s15 = smov %s470_s16 }
  0xa0   : > { %s610_s16 = smov %s612_s20  ;;  %15 = sbr.rel (!%p13_p10) target bundleno = 4 (0x4), region = 67 }
  0xa5   :  { %273 = vsyncpa [#allocation3], 1 }
  0xa6   :  { %275 = vsyncpa [#allocation3 + $0x1], 1 }

</bundles_post_ra>
